<compile_context>
chip_gen: v7x
topology: tpu7x:2x2x1
jax: 0.10.0
libtpu: 0.0.40
codegen_flags: <defaults>
</compile_context>

<pallas_src>
import jax
import jax.numpy as jnp
from jax.experimental import pallas as pl
from jax.experimental.pallas import tpu as pltpu

ALPHA = 5.0
GAMMA = 2.0          # fixed at 2 -> kernel uses an explicit square, not pow
LANE = 128


def _round_up(x, m):
    return (x + m - 1) // m * m


def _vmem_capacity_bytes():
    """Physical VMEM per core; conservative (v7x) fallback if the query fails."""
    try:
        return int(pltpu.get_tpu_info().vmem_capacity_bytes)
    except Exception:
        return 64 * 1024 * 1024


def _num_tensorcores():
    """2 on megacore chips (v4/v5p/v7x), 1 on single-TC chips (v5e/v6e)."""
    try:
        kind = jax.devices()[0].device_kind.lower()
    except Exception:
        return 1
    if "v4" in kind or "v5p" in kind or "7" in kind:
        return 2
    return 1


def _focal_elementwise(p, t):
    """Pure-JAX elementwise focal loss (reference + ragged-tail path)."""
    p = p.astype(jnp.float32)
    t = t.astype(jnp.float32)
    log_p = jnp.maximum(jnp.log(p), -100.0)
    log_1mp = jnp.maximum(jnp.log(1.0 - p), -100.0)
    bce = -(t * log_p + (1.0 - t) * log_1mp)
    pt = jnp.exp(-bce)
    return ALPHA * (1.0 - pt) ** GAMMA * bce


def _focal_sum_pallas(p2d, t2d, binary_targets):
    """Sum of focal loss over a lane-dense [n_rows, 128] slab via Pallas."""
    n_rows = p2d.shape[0]
    item_p = jnp.dtype(p2d.dtype).itemsize
    item_t = jnp.dtype(t2d.dtype).itemsize
    # Sublane packing of the narrowest input: f32 -> 8, bf16 -> 16, int8/fp8 -> 32.
    sublane_mult = 8 * (4 // min(item_p, item_t))

    vmem_cap = _vmem_capacity_bytes()
    if vmem_cap >= 96 * 1024 * 1024:          # v5e/v6e: 128 MiB physical VMEM
        tgt_block_bytes = 8 * 1024 * 1024     # -> 16384 f32 rows per block
        vmem_limit = 64 * 1024 * 1024
    else:                                     # v7x: 64 MiB physical per TC
        tgt_block_bytes = 4 * 1024 * 1024     # -> 8192 f32 rows per block
        vmem_limit = 32 * 1024 * 1024

    block_rows_cap = max(sublane_mult, tgt_block_bytes // (LANE * max(item_p, item_t)))
    block_rows = min(block_rows_cap, _round_up(n_rows, sublane_mult))

    n_blocks = pl.cdiv(n_rows, block_rows)
    ncores = min(_num_tensorcores(), n_blocks)
    steps = pl.cdiv(n_blocks, ncores)
    # Masking only needed if some (core, step) point runs past the real rows.
    need_mask = (n_rows % block_rows != 0) or (ncores * steps != n_blocks)

    def kernel(p_ref, t_ref, out_ref):
        k = pl.program_id(1)

        @pl.when(k == 0)
        def _():
            out_ref[...] = jnp.zeros_like(out_ref)

        p = p_ref[...].astype(jnp.float32)
        t = t_ref[...].astype(jnp.float32)

        if binary_targets:
            # Hard {0,1} targets: one log, no exp (1 EUP op/elem instead of 3).
            # Differs from exp(-clamped BCE) only when p (or 1-p) < e^-100.
            pt = jnp.where(t > 0.5, p, 1.0 - p)
            bce = -jnp.maximum(jnp.log(pt), -100.0)
        else:
            # binary_cross_entropy (reduce=False) with PyTorch's -100 log clamp.
            log_p = jnp.maximum(jnp.log(p), -100.0)
            log_1mp = jnp.maximum(jnp.log(1.0 - p), -100.0)
            bce = -(t * log_p + (1.0 - t) * log_1mp)
            pt = jnp.exp(-bce)

        q = 1.0 - pt
        f_loss = ALPHA * (q * q) * bce          # gamma == 2 -> q*q on the VPU

        def accumulate(val):
            # (8,128) vector partial sums kept in the resident output block;
            # the final cross-lane/sublane reduction happens once in the wrapper.
            out_ref[...] += jnp.sum(val.reshape(-1, 8, LANE), axis=0)

        if need_mask:
            blk = pl.program_id(0) * pl.num_programs(1) + k
            is_full = (blk + 1) * block_rows <= n_rows

            @pl.when(is_full)
            def _():
                accumulate(f_loss)                       # full block: no mask cost

            @pl.when(jnp.logical_not(is_full))
            def _():
                # Partial / overflow block only: select (not multiply) so any NaNs
                # from Pallas' undefined out-of-range padding are discarded.
                row = blk * block_rows + jax.lax.broadcasted_iota(
                    jnp.int32, f_loss.shape, 0)
                accumulate(jnp.where(row < n_rows, f_loss, 0.0))
        else:
            accumulate(f_loss)

    def in_idx(c, k):
        # Split blocks across the parallel core axis; clamp so fully out-of-range
        # (core, step) points re-read a valid block (its contribution is masked to 0).
        return (jnp.minimum(c * steps + k, n_blocks - 1), 0)

    n_valid = n_rows * LANE
    cost = pl.CostEstimate(
        flops=10 * n_valid,
        transcendentals=(1 if binary_targets else 3) * n_valid,
        bytes_accessed=n_valid * (item_p + item_t) + ncores * 8 * LANE * 4,
    )

    partials = pl.pallas_call(
        kernel,
        out_shape=jax.ShapeDtypeStruct((ncores * 8, LANE), jnp.float32),
        grid_spec=pltpu.PrefetchScalarGridSpec(
            num_scalar_prefetch=0,
            grid=(ncores, steps),
            in_specs=[
                pl.BlockSpec((block_rows, LANE), in_idx),
                pl.BlockSpec((block_rows, LANE), in_idx),
            ],
            out_specs=pl.BlockSpec((8, LANE), lambda c, k: (c, 0)),
        ),
        compiler_params=pltpu.CompilerParams(
            dimension_semantics=("parallel", "arbitrary"),
            vmem_limit_bytes=vmem_limit,
        ),
        cost_estimate=cost,
    )(p2d, t2d)

    return jnp.sum(partials)


def focal_loss(inputs, targets, binary_targets=False):
    """FocalLoss(alpha=5, gamma=2, logits=False, reduce=True).forward(inputs, targets)."""
    assert inputs.shape == targets.shape
    n_elems = inputs.size

    flat_p = inputs.reshape(-1)
    flat_t = targets.reshape(-1)

    aligned = (n_elems // LANE) * LANE
    total = jnp.float32(0.0)
    if aligned:
        # Lane-aligned prefix handled by the Pallas kernel (no concat/pad copy).
        p2d = flat_p[:aligned].reshape(-1, LANE)
        t2d = flat_t[:aligned].reshape(-1, LANE)
        total = total + _focal_sum_pallas(p2d, t2d, binary_targets)
    if aligned < n_elems:
        # <=127-element ragged tail: tiny plain-JAX sum added to the kernel result.
        total = total + jnp.sum(
            _focal_elementwise(flat_p[aligned:], flat_t[aligned:]))

    # reduce=True -> mean over the ORIGINAL element count.
    return (total / jnp.float32(n_elems)).astype(jnp.float32)


def _focal_loss_ref(inputs, targets):
    """Pure-JAX reference mirroring the PyTorch module."""
    return jnp.mean(_focal_elementwise(inputs, targets))


if __name__ == "__main__":
    key = jax.random.PRNGKey(0)
    k1, k2, k3, k4 = jax.random.split(key, 4)

    # Small example shapes: (batch=2, channels=4, spatial=16x16) probabilities.
    shape = (2, 4, 16, 16)
    inputs = jax.random.uniform(k1, shape, jnp.float32, minval=1e-4, maxval=1.0 - 1e-4)
    targets = (jax.random.uniform(k2, shape, jnp.float32) > 0.5).astype(jnp.float32)

    out = jax.block_until_ready(focal_loss(inputs, targets))
    ref = _focal_loss_ref(inputs, targets)
    assert jnp.allclose(out, ref, rtol=1e-5, atol=1e-6), (out, ref)

    # Binary-target fast path (fewer EUP transcendentals; v7x-oriented).
    out_fast = jax.block_until_ready(focal_loss(inputs, targets, binary_targets=True))
    assert jnp.allclose(out_fast, ref, rtol=1e-4, atol=1e-5), (out_fast, ref)

    # Ragged (non lane-multiple) size: exercises kernel prefix + plain-JAX tail.
    shape_r = (5, 431)  # 2155 elements = 2048 aligned + 107 tail
    inputs_r = jax.random.uniform(k3, shape_r, jnp.float32, minval=1e-4, maxval=1.0 - 1e-4)
    targets_r = (jax.random.uniform(k4, shape_r, jnp.float32) > 0.5).astype(jnp.float32)
    out_r = jax.block_until_ready(focal_loss(inputs_r, targets_r))
    ref_r = _focal_loss_ref(inputs_r, targets_r)
    assert jnp.allclose(out_r, ref_r, rtol=1e-5, atol=1e-6), (out_r, ref_r)

    print("KERNEL_OK")
</pallas_src>

<mosaic_0001>
module attributes {stable_mosaic.version = 11 : i64} {
  func.func @kernel(%arg0: i32, %arg1: i32, %arg2: memref<16x128xf32, #tpu.memory_space<vmem>>, %arg3: memref<16x128xf32, #tpu.memory_space<vmem>>, %arg4: memref<8x128xf32, #tpu.memory_space<vmem>>) attributes {dimension_semantics = [#tpu.dimension_semantics<parallel>, #tpu.dimension_semantics<arbitrary>], iteration_bounds = array<i64: 1, 1>, scalar_prefetch = 0 : i64, scratch_operands = 0 : i64, tpu.core_type = #tpu.core_type<tc>, window_params = [{transform_indices = @transform_0, window_bounds = array<i64: 16, 128>}, {transform_indices = @transform_1, window_bounds = array<i64: 16, 128>}, {transform_indices = @transform_2, window_bounds = array<i64: 8, 128>}]} {
    %c0_i32 = arith.constant 0 : i32
    %0 = arith.cmpi eq, %arg1, %c0_i32 : i32
    %1 = arith.extui %0 : i1 to i32
    %c0_i32_0 = arith.constant 0 : i32
    %2 = arith.cmpi ne, %1, %c0_i32_0 : i32
    scf.if %2 {
      %cst_16 = arith.constant 0.000000e+00 : f32
      %34 = vector.broadcast %cst_16 : f32 to vector<8x128xf32>
      %c0_17 = arith.constant 0 : index
      %c0_18 = arith.constant 0 : index
      %35 = vector.load %arg4[%c0_17, %c0_18] : memref<8x128xf32, #tpu.memory_space<vmem>>, vector<8x128xf32>
      tpu.vector_store %arg4[%c0_17, %c0_18], %34 {strides = array<i32>} : memref<8x128xf32, #tpu.memory_space<vmem>>, vector<8x128xf32>,
    } else {
    }
    %c0 = arith.constant 0 : index
    %c0_1 = arith.constant 0 : index
    %3 = vector.load %arg2[%c0, %c0_1] : memref<16x128xf32, #tpu.memory_space<vmem>>, vector<16x128xf32>
    %c0_2 = arith.constant 0 : index
    %c0_3 = arith.constant 0 : index
    %4 = vector.load %arg3[%c0_2, %c0_3] : memref<16x128xf32, #tpu.memory_space<vmem>>, vector<16x128xf32>
    %5 = math.log %3 : vector<16x128xf32>
    %cst = arith.constant -1.000000e+02 : f32
    %6 = vector.broadcast %cst : f32 to vector<16x128xf32>
    %7 = arith.maximumf %5, %6 : vector<16x128xf32>
    %cst_4 = arith.constant 1.000000e+00 : f32
    %8 = vector.broadcast %cst_4 : f32 to vector<16x128xf32>
    %9 = arith.subf %8, %3 : vector<16x128xf32>
    %10 = math.log %9 : vector<16x128xf32>
    %cst_5 = arith.constant -1.000000e+02 : f32
    %11 = vector.broadcast %cst_5 : f32 to vector<16x128xf32>
    %12 = arith.maximumf %10, %11 : vector<16x128xf32>
    %13 = arith.mulf %4, %7 : vector<16x128xf32>
    %cst_6 = arith.constant 1.000000e+00 : f32
    %14 = vector.broadcast %cst_6 : f32 to vector<16x128xf32>
    %15 = arith.subf %14, %4 : vector<16x128xf32>
    %16 = arith.mulf %15, %12 : vector<16x128xf32>
    %17 = arith.addf %13, %16 : vector<16x128xf32>
    %cst_7 = arith.constant 0.000000e+00 : f32
    %18 = vector.broadcast %cst_7 : f32 to vector<16x128xf32>
    %19 = arith.subf %18, %17 : vector<16x128xf32>
    %cst_8 = arith.constant 0.000000e+00 : f32
    %20 = vector.broadcast %cst_8 : f32 to vector<16x128xf32>
    %21 = arith.subf %20, %19 : vector<16x128xf32>
    %22 = math.exp %21 : vector<16x128xf32>
    %cst_9 = arith.constant 1.000000e+00 : f32
    %23 = vector.broadcast %cst_9 : f32 to vector<16x128xf32>
    %24 = arith.subf %23, %22 : vector<16x128xf32>
    %25 = arith.mulf %24, %24 : vector<16x128xf32>
    %cst_10 = arith.constant 5.000000e+00 : f32
    %26 = vector.broadcast %cst_10 : f32 to vector<16x128xf32>
    %27 = arith.mulf %26, %25 : vector<16x128xf32>
    %28 = arith.mulf %27, %19 : vector<16x128xf32>
    %c0_11 = arith.constant 0 : index
    %c0_12 = arith.constant 0 : index
    %29 = vector.load %arg4[%c0_11, %c0_12] : memref<8x128xf32, #tpu.memory_space<vmem>>, vector<8x128xf32>
    %30 = vector.shape_cast %28 : vector<16x128xf32> to vector<2x8x128xf32>
    %cst_13 = arith.constant dense<0.000000e+00> : vector<8x128xf32>
    %31 = vector.multi_reduction <add>, %30, %cst_13 [0] : vector<2x8x128xf32> to vector<8x128xf32>
    %32 = arith.addf %29, %31 : vector<8x128xf32>
    %c0_14 = arith.constant 0 : index
    %c0_15 = arith.constant 0 : index
    %33 = vector.load %arg4[%c0_14, %c0_15] : memref<8x128xf32, #tpu.memory_space<vmem>>, vector<8x128xf32>
    tpu.vector_store %arg4[%c0_14, %c0_15], %32 {strides = array<i32>} : memref<8x128xf32, #tpu.memory_space<vmem>>, vector<8x128xf32>,
    return
  }
  func.func @transform_0(%arg0: i32, %arg1: i32) -> (i32, i32) {
    %c1_i32 = arith.constant 1 : i32
    %0 = arith.muli %arg0, %c1_i32 : i32
    %1 = arith.addi %0, %arg1 : i32
    %c0_i32 = arith.constant 0 : i32
    %2 = arith.minsi %1, %c0_i32 : i32
    %c0_i32_0 = arith.constant 0 : i32
    %c0_i32_1 = arith.constant 0 : i32
    return %2, %c0_i32_0 : i32, i32
  }
  func.func @transform_1(%arg0: i32, %arg1: i32) -> (i32, i32) {
    %c1_i32 = arith.constant 1 : i32
    %0 = arith.muli %arg0, %c1_i32 : i32
    %1 = arith.addi %0, %arg1 : i32
    %c0_i32 = arith.constant 0 : i32
    %2 = arith.minsi %1, %c0_i32 : i32
    %c0_i32_0 = arith.constant 0 : i32
    %c0_i32_1 = arith.constant 0 : i32
    return %2, %c0_i32_0 : i32, i32
  }
  func.func @transform_2(%arg0: i32, %arg1: i32) -> (i32, i32) {
    %c0_i32 = arith.constant 0 : i32
    %c0_i32_0 = arith.constant 0 : i32
    return %arg0, %c0_i32 : i32, i32
  }
}

</mosaic_0001>

<bundles_post_ra>
// kernel: tpu_custom_call.1
= control target key start
LH: loop header
LB: loop body
LE: loop exit
PB: predicated region body
PF: predicated region fallthrough
CT: control target
= control target key end

     0   :  { %7 = vsyncpa [#allocation3], 0  ;;  %s277_s0 = inlined_call_operand.hbm [shape: f32[16,128], index: 0, kind: input, shape index: {}]   ;;  %s278_s1 = inlined_call_operand.hbm [shape: f32[16,128], index: 1, kind: input, shape index: {}]   ;;  %s279_s2 = inlined_call_operand.hbm [shape: f32[8,128], index: 2, kind: output, shape index: {}]  }
   0x1   :  { %8 = vsyncpa [#allocation6], 0 }
   0x2   :  { %9 = vsyncpa [#allocation4], 0  ;;  %s221_s9 = smov [#allocation2]   ;;  %s149_s13 = scalar_lea.hbm %s277_s0, 256 }
   0x3   :  { %s21_s10 = sshll.u32 %s221_s9, 4  ;;  %p150_p0 = scmp.ne.s32.totalorder %s277_s0, %s149_s13  ;;  %s22_s10 = int_to_ptr.vmem [resolvable:$true] %s21_s10 }
   0x4   :  { %p153_p1 = scmp.lt.u32.totalorder %s149_s13, %s277_s0 }
   0x6   :  { %p155_p2 = pnand %p153_p1, %p150_p0 }
   0x8   :  { %158 = shalt.err (!%p155_p2)
}
   0x9   :  { %s159_s18 = scalar_lea.vmem %s22_s10, 256  ;;  %p164_p4 = scmp.lt.s32.totalorder %s22_s10, %s22_s10 }
   0xa   :  { %p160_p3 = scmp.ne.s32.totalorder %s22_s10, %s159_s18  ;;  %p165_p5 = scmp.lt.s32.totalorder %s159_s18, %s159_s18 }
   0xc   :  { %p166_p6 = por %p165_p5, %p164_p4 }
   0xe   :  { %p167_p7 = pnand %p166_p6, %p160_p3 }
  0x10   :  { %170 = shalt.err (!%p167_p7)
}
  0x11   :  { %s222_s19 = smov 128   ;;  %s223_s20 = smov 8  }
  0x12   :  { %27 = dma.hbm_to_vmem [thread:$0]  %s277_s0, 256, %s22_s10, [#allocation3], %s222_s19, %s222_s19, %s223_s20  }
  0x13   :  { %s224_s23 = smov [#allocation5]   ;;  %s171_s27 = scalar_lea.hbm %s278_s1, 256 }
  0x14   :  { %s39_s24 = sshll.u32 %s224_s23, 4  ;;  %p172_p8 = scmp.ne.s32.totalorder %s278_s1, %s171_s27  ;;  %s40_s24 = int_to_ptr.vmem [resolvable:$true] %s39_s24 }
  0x15   :  { %p175_p9 = scmp.lt.u32.totalorder %s171_s27, %s278_s1 }
  0x17   :  { %p177_p10 = pnand %p175_p9, %p172_p8 }
  0x19   :  { %180 = shalt.err (!%p177_p10)
}
  0x1a   :  { %s181_s4 = scalar_lea.vmem %s40_s24, 256  ;;  %p186_p12 = scmp.lt.s32.totalorder %s40_s24, %s40_s24 }
  0x1b   :  { %p182_p11 = scmp.ne.s32.totalorder %s40_s24, %s181_s4  ;;  %p187_p13 = scmp.lt.s32.totalorder %s181_s4, %s181_s4 }
  0x1d   :  { %p188_p0 = por %p187_p13, %p186_p12 }
  0x1f   :  { %p189_p1 = pnand %p188_p0, %p182_p11 }
  0x21   :  { %192 = shalt.err (!%p189_p1)
}
  0x22   :  { %45 = dma.hbm_to_vmem [thread:$0]  %s278_s1, 256, %s40_s24, [#allocation6], %s222_s19, %s222_s19, %s223_s20  }
  0x23   :  { %215 = dma.done.wait [#allocation3], 256  }
  0x24   :  { %216 = vsyncadd [#allocation3], 4294967040 }
  0x25   :  { %217 = dma.done.wait [#allocation6], 256  }
  0x26   :  { %218 = vsyncadd [#allocation6], 4294967040  ;;  %v65_v0 = vld [vmem:[#allocation2] sm:$0xff]  ;;  %v66_v1 = vld [vmem:[#allocation2 + $0x8] sm:$0xff]  ;;  %s225_s1 = smov [#allocation7]  }
  0x27   :  { %137 = vlog2.f32 %v65_v0  ;;  %v75_v2 = vsub.f32 1.0, %v65_v0  ;;  %v76_v3 = vsub.f32 1.0, %v66_v1  ;;  %v67_v5 = vld [vmem:[#allocation5] sm:$0xff]  ;;  %v68_v7 = vld [vmem:[#allocation5 + $0x8] sm:$0xff]  ;;  %s117_s6 = sshll.u32 %s225_s1, 4  ;;  %s118_s6 = int_to_ptr.vmem [resolvable:$true] %s117_s6 }
  0x28   :  { %139 = vlog2.f32 %v66_v1  ;;  %v85_v14 = vsub.f32 1.0, %v67_v5  ;;  %v86_v17 = vsub.f32 1.0, %v68_v7  ;;  %s193_s7 = scalar_lea.vmem %s118_s6, 128  ;;  %p198_p3 = scmp.lt.s32.totalorder %s118_s6, %s118_s6 }
  0x29   :  { %141 = vlog2.f32 %v75_v2  ;;  %p194_p2 = scmp.ne.s32.totalorder %s118_s6, %s193_s7  ;;  %p199_p4 = scmp.lt.s32.totalorder %s193_s7, %s193_s7 }
  0x2a   :  { %143 = vlog2.f32 %v76_v3 }
  0x2b   :  { %p200_p5 = por %p199_p4, %p198_p3 }
  0x2d   :  { %p201_p6 = pnand %p200_p5, %p194_p2 }
  0x31   :  { %v138_v4 = vpop.eup %137 }
  0x32   :  { %v140_v6 = vpop.eup %139  ;;  %v70_v8 = vmul.f32 0.6931472, %v138_v4 }
  0x33   :  { %v142_v9 = vpop.eup %141  ;;  %v72_v10 = vmul.f32 0.6931472, %v140_v6 }
  0x34   :  { %v144_v11 = vpop.eup %143  ;;  %v73_v12 = vmax.f32 %v70_v8, -100.0  ;;  %v78_v13 = vmul.f32 0.6931472, %v142_v9 }
  0x35   :  { %v74_v15 = vmax.f32 %v72_v10, -100.0  ;;  %v80_v16 = vmul.f32 0.6931472, %v144_v11 }
  0x36   :  { %v81_v18 = vmax.f32 %v78_v13, -100.0  ;;  %v83_v19 = vmul.f32 %v73_v12, %v67_v5 }
  0x37   :  { %v82_v20 = vmax.f32 %v80_v16, -100.0  ;;  %v84_v21 = vmul.f32 %v74_v15, %v68_v7 }
  0x38   :  { %v87_v22 = vmul.f32 %v85_v14, %v81_v18 }
  0x39   :  { %v88_v23 = vmul.f32 %v86_v17, %v82_v20 }
  0x3a   :  { %v89_v24 = vadd.f32 %v87_v22, %v83_v19 }
  0x3b   :  { %v90_v25 = vadd.f32 %v88_v23, %v84_v21 }
  0x3c   :  { %v91_v26 = vsub.f32 0.0, %v89_v24 }
  0x3d   :  { %v92_v27 = vsub.f32 0.0, %v90_v25 }
  0x3e   :  { %v93_v28 = vsub.f32 0.0, %v91_v26 }
  0x3f   :  { %v94_v29 = vsub.f32 0.0, %v92_v27 }
  0x40   :  { %v95_v30 = vmul.f32 1.442695, %v93_v28 }
  0x41   :  { %v97_v31 = vmul.f32 1.442695, %v94_v29 }
  0x42   :  { %145 = vpow2.f32 %v95_v30 }
  0x43   :  { %147 = vpow2.f32 %v97_v31 }
  0x4c   :  { %v146_v32 = vpop.eup %145 }
  0x4d   :  { %v148_v33 = vpop.eup %147  ;;  %v99_v34 = vsub.f32 1.0, %v146_v32 }
  0x4e   :  { %v100_v35 = vsub.f32 1.0, %v148_v33 }
  0x4f   :  { %v101_v36 = vmul.f32 %v99_v34, %v99_v34 }
  0x50   :  { %v102_v37 = vmul.f32 %v100_v35, %v100_v35 }
  0x51   :  { %v103_v38 = vmul.f32 5.0, %v101_v36 }
  0x52   :  { %v104_v39 = vmul.f32 5.0, %v102_v37 }
  0x53   :  { %v105_v40 = vmul.f32 %v103_v38, %v91_v26 }
  0x54   :  { %v106_v41 = vmul.f32 %v104_v39, %v92_v27 }
  0x56   :  { %v108_v42 = vadd.f32 %v106_v41, %v105_v40 }
  0x58   :  { %110 = vst [vmem:[#allocation7] sm:$0xff] %v108_v42 }
  0x59   :  { %204 = shalt.err (!%p201_p6)
}
  0x5a   :  { %s205_s10 = scalar_lea.hbm %s279_s2, 128 }
  0x5b   :  { %p206_p7 = scmp.ne.s32.totalorder %s279_s2, %s205_s10  ;;  %p209_p8 = scmp.lt.u32.totalorder %s205_s10, %s279_s2 }
  0x5d   :  { %p211_p9 = pnand %p209_p8, %p206_p7 }
  0x5f   :  { %214 = shalt.err (!%p211_p9)
}
  0x60   :  { %120 = dma.vmem_to_hbm [thread:$0]  %s118_s6, 128, %s279_s2, [#allocation4]  }
  0x61   :  { %219 = dma.done.wait [#allocation4], 128  }
  0x62   :  { %220 = vsyncadd [#allocation4], 4294967168 }
  0x63   :  { %124 = vsyncpa [#allocation3], 1 }
  0x64   :  { %125 = vsyncpa [#allocation6], 1 }
  0x65   :  { %126 = vsyncpa [#allocation4], 1 }

</bundles_post_ra>
